<compile_context>
chip_gen: v5e
topology: v5e:2x2
jax: 0.10.0
libtpu: 0.0.40
codegen_flags: <defaults>
</compile_context>

<pallas_src>
import math

import jax
import jax.numpy as jnp
from jax.experimental import pallas as pl
from jax.experimental.pallas import tpu as pltpu


def critic_kernel(x_ref, u_ref, w1_ref, b1_ref, w2_ref, b2_ref, w3_ref, b3_ref,
                  out_ref, xu_ref):
    S = x_ref.shape[1]
    A = u_ref.shape[1]

    # In-kernel concat: pack bf16 x|u into one (TB, S+A) scratch so fc1 is a
    # single MXU pass (2x(TB/8) -> TB/8 vmatmul pushes).  Cheap masked vector
    # stores; no extra HBM traffic.
    xu_ref[:, :S] = x_ref[...].astype(jnp.bfloat16)
    xu_ref[:, S:S + A] = u_ref[...].astype(jnp.bfloat16)

    # fc1 + ReLU.  bf16 MXU operands, f32 accumulate; elementwise kept f32
    # so the same kernel runs on v5e (no bf16 VPU).
    h1 = jnp.dot(xu_ref[...], w1_ref[...],
                 preferred_element_type=jnp.float32) + b1_ref[...]
    h1 = jnp.maximum(h1, 0.0)

    # fc2 + ReLU.
    h2 = jnp.dot(h1.astype(jnp.bfloat16), w2_ref[...],
                 preferred_element_type=jnp.float32) + b2_ref[...]
    h2 = jnp.maximum(h2, 0.0)

    # out layer (H -> 1): VPU multiply + lane reduce (keeps the MXU free),
    # stored lane-dense as a (1, TB) row.
    q = jnp.sum(h2 * w3_ref[...], axis=-1) + b3_ref[0, :]   # (TB,)
    out_ref[0, :] = q.astype(out_ref.dtype)


def prepare_critic_params(params):
    """One-time prep: bf16 matmul weights, f32 biases, (1,H) head row.

    Do this once when the critic is created / updated, NOT per forward call.
    """
    w1, b1, w2, b2, w3, b3 = params
    H = w2.shape[0]
    return (
        jnp.asarray(w1, jnp.bfloat16),            # (S+A, H) merged fc1 weight
        jnp.asarray(b1, jnp.float32).reshape(1, H),
        jnp.asarray(w2, jnp.bfloat16),            # (H, H)
        jnp.asarray(b2, jnp.float32).reshape(1, H),
        jnp.asarray(w3, jnp.float32).reshape(1, H),   # head as a lane row
        jnp.asarray(b3, jnp.float32).reshape(1, 1),
    )


def _pick_tb(B, core_parallel):
    """Batch-tile size: big enough to amortize per-step overhead, small enough
    for v5e's 16 MiB scoped-VMEM default.  Multiple of 256 when tiling."""
    TB_CAP = 1024
    if core_parallel and B > 256:
        # v7x: make sure there are >= 2 grid steps so both TensorCores work.
        half = max(256, (B // 2 // 256) * 256)
        return min(half, TB_CAP)
    return B if B <= TB_CAP else TB_CAP


def critic_forward(x, u, prepared_params, *, core_parallel=False):
    """x: (B, state_dim), u: (B, action_dim) -> (B, 1) float32.

    `prepared_params` must come from `prepare_critic_params`.
    Set core_parallel=True on v7x to shard batch tiles over both TensorCores.
    """
    w1, b1, w2, b2, w3r, b3 = prepared_params
    B, S = x.shape
    A = u.shape[1]
    SA, H = w1.shape
    assert SA == S + A

    TB = _pick_tb(B, core_parallel)
    num_tiles = pl.cdiv(B, TB)

    const = lambda i: (0, 0)   # weights / biases stay VMEM-resident
    batch = lambda i: (i, 0)   # batch-tiled operands / output rows

    dim_sem = (pltpu.CORE_PARALLEL,) if core_parallel else ("parallel",)

    out_rows = pl.pallas_call(
        critic_kernel,
        out_shape=jax.ShapeDtypeStruct((num_tiles, TB), jnp.float32),
        grid=(num_tiles,),
        in_specs=[
            pl.BlockSpec((TB, S), batch),     # x
            pl.BlockSpec((TB, A), batch),     # u
            pl.BlockSpec((SA, H), const),     # w1 merged (bf16)
            pl.BlockSpec((1, H), const),      # b1 (f32)
            pl.BlockSpec((H, H), const),      # w2 (bf16)
            pl.BlockSpec((1, H), const),      # b2 (f32)
            pl.BlockSpec((1, H), const),      # w3 row (f32)
            pl.BlockSpec((1, 1), const),      # b3 (f32)
        ],
        out_specs=pl.BlockSpec((1, TB), batch),   # lane-dense (1, TB) row
        scratch_shapes=[pltpu.VMEM((TB, SA), jnp.bfloat16)],  # packed x|u
        compiler_params=pltpu.CompilerParams(dimension_semantics=dim_sem),
    )(x, u, w1, b1, w2, b2, w3r, b3)

    # (num_tiles, TB) -> (B, 1); drops any padded tail rows of the last tile.
    return out_rows.reshape(-1)[:B].reshape(B, 1)


def init_critic_params(key, state_dim, action_dim, hidden_dim=256):
    """Deterministic init mimicking nn.Linear's U(-1/sqrt(fan_in), 1/sqrt(fan_in))."""
    def linear(key, fan_in, fan_out):
        kw, kb = jax.random.split(key)
        bound = 1.0 / math.sqrt(fan_in)
        w = jax.random.uniform(kw, (fan_in, fan_out), jnp.float32, -bound, bound)
        b = jax.random.uniform(kb, (1, fan_out), jnp.float32, -bound, bound)
        return w, b

    k1, k2, k3 = jax.random.split(key, 3)
    w1, b1 = linear(k1, state_dim + action_dim, hidden_dim)
    w2, b2 = linear(k2, hidden_dim, hidden_dim)
    w3, b3 = linear(k3, hidden_dim, 1)
    return (w1, b1, w2, b2, w3, b3)


def critic_reference(x, u, params):
    """Pure-JAX f32 reference for correctness checking."""
    w1, b1, w2, b2, w3, b3 = params
    xu = jnp.concatenate([x, u], axis=1)
    h1 = jnp.maximum(xu @ w1 + b1, 0.0)
    h2 = jnp.maximum(h1 @ w2 + b2, 0.0)
    return h2 @ w3 + b3


if __name__ == "__main__":
    # Small shapes; HIDDEN=128 keeps the lane dim aligned with the 128-lane vreg.
    B, STATE_DIM, ACTION_DIM, HIDDEN = 8, 24, 8, 128

    key = jax.random.PRNGKey(0)
    kx, ku, kp = jax.random.split(key, 3)

    x = jax.random.normal(kx, (B, STATE_DIM), jnp.float32)
    u = jax.random.normal(ku, (B, ACTION_DIM), jnp.float32)
    params = init_critic_params(kp, STATE_DIM, ACTION_DIM, HIDDEN)
    prepared = prepare_critic_params(params)   # one-time, outside the hot path

    q = critic_forward(x, u, prepared)
    jax.block_until_ready(q)
    assert q.shape == (B, 1) and q.dtype == jnp.float32

    # Loose numeric check vs. the f32 reference (bf16 weights -> small diffs).
    ref = critic_reference(x, u, params)
    err = float(jnp.max(jnp.abs(q - ref)))
    scale = float(jnp.max(jnp.abs(ref))) + 1.0
    assert err < 0.05 * scale, f"mismatch: max_abs_err={err}, scale={scale}"

    print("KERNEL_OK")
</pallas_src>

<mosaic_0001>
module attributes {stable_mosaic.version = 11 : i64} {
  func.func @critic_kernel(%arg0: i32, %arg1: memref<8x24xf32, #tpu.memory_space<vmem>>, %arg2: memref<8x8xf32, #tpu.memory_space<vmem>>, %arg3: memref<32x128xbf16, #tpu.memory_space<vmem>>, %arg4: memref<1x128xf32, #tpu.memory_space<vmem>>, %arg5: memref<128x128xbf16, #tpu.memory_space<vmem>>, %arg6: memref<1x128xf32, #tpu.memory_space<vmem>>, %arg7: memref<1x128xf32, #tpu.memory_space<vmem>>, %arg8: memref<1x1xf32, #tpu.memory_space<vmem>>, %arg9: memref<1x8xf32, #tpu.memory_space<vmem>>, %arg10: memref<8x32xbf16, #tpu.memory_space<vmem>>) attributes {dimension_semantics = [#tpu.dimension_semantics<parallel>], iteration_bounds = array<i64: 1>, scalar_prefetch = 0 : i64, scratch_operands = 1 : i64, tpu.core_type = #tpu.core_type<tc>, window_params = [{transform_indices = @transform_0, window_bounds = array<i64: 8, 24>}, {transform_indices = @transform_1, window_bounds = array<i64: 8, 8>}, {pipeline_mode = #tpu.pipeline_mode<synchronous>, transform_indices = @transform_2, window_bounds = array<i64: 32, 128>}, {pipeline_mode = #tpu.pipeline_mode<synchronous>, transform_indices = @transform_3, window_bounds = array<i64: 1, 128>}, {pipeline_mode = #tpu.pipeline_mode<synchronous>, transform_indices = @transform_4, window_bounds = array<i64: 128, 128>}, {pipeline_mode = #tpu.pipeline_mode<synchronous>, transform_indices = @transform_5, window_bounds = array<i64: 1, 128>}, {pipeline_mode = #tpu.pipeline_mode<synchronous>, transform_indices = @transform_6, window_bounds = array<i64: 1, 128>}, {pipeline_mode = #tpu.pipeline_mode<synchronous>, transform_indices = @transform_7, window_bounds = array<i64: 1, 1>}, {transform_indices = @transform_8, window_bounds = array<i64: 1, 8>}]} {
    %c0 = arith.constant 0 : index
    %c0_0 = arith.constant 0 : index
    %0 = vector.load %arg1[%c0, %c0_0] : memref<8x24xf32, #tpu.memory_space<vmem>>, vector<8x24xf32>
    %1 = arith.truncf %0 : vector<8x24xf32> to vector<8x24xbf16>
    %c0_1 = arith.constant 0 : index
    %c0_2 = arith.constant 0 : index
    %2 = vector.load %arg10[%c0_1, %c0_2] : memref<8x32xbf16, #tpu.memory_space<vmem>>, vector<8x24xbf16>
    tpu.vector_store %arg10[%c0_1, %c0_2], %1 {strides = array<i32>} : memref<8x32xbf16, #tpu.memory_space<vmem>>, vector<8x24xbf16>,
    %c0_3 = arith.constant 0 : index
    %c0_4 = arith.constant 0 : index
    %3 = vector.load %arg2[%c0_3, %c0_4] : memref<8x8xf32, #tpu.memory_space<vmem>>, vector<8x8xf32>
    %4 = arith.truncf %3 : vector<8x8xf32> to vector<8x8xbf16>
    %c0_5 = arith.constant 0 : index
    %c24 = arith.constant 24 : index
    %5 = vector.load %arg10[%c0_5, %c24] : memref<8x32xbf16, #tpu.memory_space<vmem>>, vector<8x8xbf16>
    tpu.vector_store %arg10[%c0_5, %c24], %4 {strides = array<i32>} : memref<8x32xbf16, #tpu.memory_space<vmem>>, vector<8x8xbf16>,
    %c0_6 = arith.constant 0 : index
    %c0_7 = arith.constant 0 : index
    %6 = vector.load %arg10[%c0_6, %c0_7] : memref<8x32xbf16, #tpu.memory_space<vmem>>, vector<8x32xbf16>
    %c0_8 = arith.constant 0 : index
    %c0_9 = arith.constant 0 : index
    %7 = vector.load %arg3[%c0_8, %c0_9] : memref<32x128xbf16, #tpu.memory_space<vmem>>, vector<32x128xbf16>
    %cst = arith.constant dense<0.000000e+00> : vector<8x128xf32>
    %8 = tpu.matmul %6, %7, %cst {dimension_numbers = #tpu.dot_dimension_numbers<[1], [0], [0], [1], [0, 0, 1, 1], [], []>} : vector<8x32xbf16>, vector<32x128xbf16>, vector<8x128xf32> -> vector<8x128xf32>
    %c0_10 = arith.constant 0 : index
    %c0_11 = arith.constant 0 : index
    %9 = vector.load %arg4[%c0_10, %c0_11] : memref<1x128xf32, #tpu.memory_space<vmem>>, vector<1x128xf32>
    %10 = vector.broadcast %9 : vector<1x128xf32> to vector<8x128xf32>
    %11 = arith.addf %8, %10 : vector<8x128xf32>
    %cst_12 = arith.constant 0.000000e+00 : f32
    %12 = vector.broadcast %cst_12 : f32 to vector<8x128xf32>
    %13 = arith.maximumf %11, %12 : vector<8x128xf32>
    %14 = arith.truncf %13 : vector<8x128xf32> to vector<8x128xbf16>
    %c0_13 = arith.constant 0 : index
    %c0_14 = arith.constant 0 : index
    %15 = vector.load %arg5[%c0_13, %c0_14] : memref<128x128xbf16, #tpu.memory_space<vmem>>, vector<128x128xbf16>
    %cst_15 = arith.constant dense<0.000000e+00> : vector<8x128xf32>
    %16 = tpu.matmul %14, %15, %cst_15 {dimension_numbers = #tpu.dot_dimension_numbers<[1], [0], [0], [1], [0, 0, 1, 1], [], []>} : vector<8x128xbf16>, vector<128x128xbf16>, vector<8x128xf32> -> vector<8x128xf32>
    %c0_16 = arith.constant 0 : index
    %c0_17 = arith.constant 0 : index
    %17 = vector.load %arg6[%c0_16, %c0_17] : memref<1x128xf32, #tpu.memory_space<vmem>>, vector<1x128xf32>
    %18 = vector.broadcast %17 : vector<1x128xf32> to vector<8x128xf32>
    %19 = arith.addf %16, %18 : vector<8x128xf32>
    %cst_18 = arith.constant 0.000000e+00 : f32
    %20 = vector.broadcast %cst_18 : f32 to vector<8x128xf32>
    %21 = arith.maximumf %19, %20 : vector<8x128xf32>
    %c0_19 = arith.constant 0 : index
    %c0_20 = arith.constant 0 : index
    %22 = vector.load %arg7[%c0_19, %c0_20] : memref<1x128xf32, #tpu.memory_space<vmem>>, vector<1x128xf32>
    %23 = vector.broadcast %22 : vector<1x128xf32> to vector<8x128xf32>
    %24 = arith.mulf %21, %23 : vector<8x128xf32>
    %cst_21 = arith.constant dense<0.000000e+00> : vector<8xf32>
    %25 = vector.multi_reduction <add>, %24, %cst_21 [1] : vector<8x128xf32> to vector<8xf32>
    %c0_22 = arith.constant 0 : index
    %c0_23 = arith.constant 0 : index
    %26 = vector.load %arg8[%c0_22, %c0_23] : memref<1x1xf32, #tpu.memory_space<vmem>>, vector<1x1xf32>
    %27 = vector.shape_cast %26 : vector<1x1xf32> to vector<1xf32>
    %28 = vector.broadcast %27 : vector<1xf32> to vector<8xf32>
    %29 = arith.addf %25, %28 : vector<8xf32>
    %c0_24 = arith.constant 0 : index
    %c0_25 = arith.constant 0 : index
    %30 = vector.load %arg9[%c0_24, %c0_25] : memref<1x8xf32, #tpu.memory_space<vmem>>, vector<1x8xf32>
    %31 = vector.shape_cast %30 : vector<1x8xf32> to vector<8xf32>
    %32 = vector.shape_cast %29 : vector<8xf32> to vector<1x8xf32>
    tpu.vector_store %arg9[%c0_24, %c0_25], %32 {strides = array<i32>} : memref<1x8xf32, #tpu.memory_space<vmem>>, vector<1x8xf32>,
    return
  }
  func.func @transform_0(%arg0: i32) -> (i32, i32) {
    %c0_i32 = arith.constant 0 : i32
    %c0_i32_0 = arith.constant 0 : i32
    return %arg0, %c0_i32 : i32, i32
  }
  func.func @transform_1(%arg0: i32) -> (i32, i32) {
    %c0_i32 = arith.constant 0 : i32
    %c0_i32_0 = arith.constant 0 : i32
    return %arg0, %c0_i32 : i32, i32
  }
  func.func @transform_2(%arg0: i32) -> (i32, i32) {
    %c0_i32 = arith.constant 0 : i32
    %c0_i32_0 = arith.constant 0 : i32
    %c0_i32_1 = arith.constant 0 : i32
    return %c0_i32, %c0_i32_0 : i32, i32
  }
  func.func @transform_3(%arg0: i32) -> (i32, i32) {
    %c0_i32 = arith.constant 0 : i32
    %c0_i32_0 = arith.constant 0 : i32
    %c0_i32_1 = arith.constant 0 : i32
    return %c0_i32, %c0_i32_0 : i32, i32
  }
  func.func @transform_4(%arg0: i32) -> (i32, i32) {
    %c0_i32 = arith.constant 0 : i32
    %c0_i32_0 = arith.constant 0 : i32
    %c0_i32_1 = arith.constant 0 : i32
    return %c0_i32, %c0_i32_0 : i32, i32
  }
  func.func @transform_5(%arg0: i32) -> (i32, i32) {
    %c0_i32 = arith.constant 0 : i32
    %c0_i32_0 = arith.constant 0 : i32
    %c0_i32_1 = arith.constant 0 : i32
    return %c0_i32, %c0_i32_0 : i32, i32
  }
  func.func @transform_6(%arg0: i32) -> (i32, i32) {
    %c0_i32 = arith.constant 0 : i32
    %c0_i32_0 = arith.constant 0 : i32
    %c0_i32_1 = arith.constant 0 : i32
    return %c0_i32, %c0_i32_0 : i32, i32
  }
  func.func @transform_7(%arg0: i32) -> (i32, i32) {
    %c0_i32 = arith.constant 0 : i32
    %c0_i32_0 = arith.constant 0 : i32
    %c0_i32_1 = arith.constant 0 : i32
    return %c0_i32, %c0_i32_0 : i32, i32
  }
  func.func @transform_8(%arg0: i32) -> (i32, i32) {
    %c0_i32 = arith.constant 0 : i32
    %c0_i32_0 = arith.constant 0 : i32
    return %arg0, %c0_i32 : i32, i32
  }
}

</mosaic_0001>

<bundles_post_ra>
// kernel: tpu_custom_call.1
= control target key start
LH: loop header
LB: loop body
LE: loop exit
PB: predicated region body
PF: predicated region fallthrough
CT: control target
= control target key end

     0   :  { %s540_s0 = inlined_call_operand.hbm [shape: f32[8,24], index: 0, kind: input, shape index: {}]   ;;  %s541_s1 = inlined_call_operand.hbm [shape: f32[8,8], index: 1, kind: input, shape index: {}]   ;;  %s542_s2 = inlined_call_operand.hbm [shape: bf16[32,128], index: 2, kind: input, shape index: {}]   ;;  %s543_s3 = inlined_call_operand.vmem [shape: f32[1,128], index: 3, kind: input, shape index: {}]   ;;  %s544_s4 = inlined_call_operand.hbm [shape: bf16[128,128], index: 4, kind: input, shape index: {}]   ;;  %s545_s5 = inlined_call_operand.vmem [shape: f32[1,128], index: 5, kind: input, shape index: {}]   ;;  %s546_s6 = inlined_call_operand.vmem [shape: f32[1,128], index: 6, kind: input, shape index: {}]   ;;  %s547_s7 = inlined_call_operand.<no memory space> [shape: f32[1,1], index: 7, kind: input, shape index: {}]   ;;  %s548_s8 = inlined_call_operand.hbm [shape: f32[1,8], index: 8, kind: output, shape index: {}]  }
   0x1   :  { %v13_v0 = vstv %s547_s7 }
   0x2   :  { %14 = vst [vmem:[#allocation3] sm:$0x1] %v13_v0 }
   0x3   :  { %15 = vsyncpa [#allocation5], 0 }
   0x4   :  { %16 = vsyncpa [#allocation8], 0 }
   0x5   :  { %17 = vsyncpa [#allocation11], 0  ;;  %s35_s9 = sshll.u32 %s541_s1, 4  ;;  %s36_s9 = int_to_ptr.hbm [resolvable:$true] %s35_s9 }
   0x6   :  { %18 = vsyncpa [#allocation6], 0  ;;  %s459_s10 = smov [#allocation7]   ;;  %s24_s14 = sshll.u32 %s540_s0, 4  ;;  %s25_s14 = int_to_ptr.hbm [resolvable:$true] %s24_s14 }
   0x7   :  { %s37_s11 = sshll.u32 %s459_s10, 4  ;;  %s460_s7 = smov [#allocation4]   ;;  %s38_s11 = int_to_ptr.vmem [resolvable:$true] %s37_s11 }
   0x8   :  { %40 = dma.hbm_to_vmem [thread:$0]  %s36_s9, 128, %s38_s11, [#allocation8]  }
   0x9   :  { %s26_s15 = sshll.u32 %s460_s7, 4  ;;  %s45_s18 = sshll.u32 %s542_s2, 4  ;;  %s27_s15 = int_to_ptr.vmem [resolvable:$true] %s26_s15  ;;  %s46_s18 = int_to_ptr.hbm [resolvable:$true] %s45_s18 }
   0xa   :  { %29 = dma.hbm_to_vmem [thread:$0]  %s25_s14, 128, %s27_s15, [#allocation5]  }
   0xb   :  { %s461_s1 = smov [#allocation9]   ;;  %s60_s22 = sshll.u32 %s544_s4, 4  ;;  %s61_s22 = int_to_ptr.hbm [resolvable:$true] %s60_s22 }
   0xc   :  { %s47_s19 = sshll.u32 %s461_s1, 4  ;;  %s462_s23 = smov 64   ;;  %s48_s19 = int_to_ptr.vmem [resolvable:$true] %s47_s19 }
   0xd   :  { %s463_s0 = smov 4   ;;  %s464_s24 = smov [#allocation10]  }
   0xe   :  { %53 = dma.hbm_to_vmem [thread:$0]  %s46_s18, 256, %s48_s19, [#allocation8], %s462_s23, %s462_s23, %s463_s0  }
   0xf   :  { %s62_s25 = sshll.u32 %s464_s24, 4  ;;  %s63_s25 = int_to_ptr.vmem [resolvable:$true] %s62_s25 }
  0x10   :  { %68 = dma.hbm_to_vmem [thread:$0]  %s61_s22, 1024, %s63_s25, [#allocation11], %s462_s23, %s462_s23, %s463_s0  }
  0x11   :  { %451 = dma.done.wait [#allocation5], 128  }
  0x12   :  { %452 = vsyncadd [#allocation5], 4294967168 }
  0x13   :  { %453 = dma.done.wait [#allocation8], 384  }
  0x14   :  { %454 = vsyncadd [#allocation8], 4294966912 }
  0x15   :  { %455 = dma.done.wait [#allocation11], 1024  }
  0x16   :  { %456 = vsyncadd [#allocation11], 4294966272  ;;  %v96_v1 = vld [vmem:[#allocation7] sm:$0xff]  ;;  %s465_s2 = smov 24   ;;  %vm94_vm0 = vcmask 191488   ;;  %v92_v3 = vld [vmem:[#allocation4] sm:$0xff]  ;;  %v242_v33 = vlaneseq }
  0x17   :  { %v97_v2 = vpack.c.bf16 %v96_v1, %v96_v1  ;;  %v93_v4 = vpack.c.bf16 %v92_v3, %v92_v3  ;;  %v309_v5 = vld [vmem:[#allocation9 + $0x8] sm:$0xff]  ;;  %v308_v6 = vld [vmem:[#allocation9] sm:$0xff]  ;;  %v315_v9 = vld [vmem:[#allocation10 + $0x28] sm:$0xff]  ;;  %vm102_vm1 = vcmask 257216   ;;  %vm125_vm2 = vcmask 261120  }
  0x18   :  { %135 = vmatpush.bf16.msra.mxu0 %v309_v5  ;;  %v317_v7 = vld [vmem:[#allocation10 + $0x38] sm:$0xff]  ;;  %v316_v8 = vld [vmem:[#allocation10 + $0x30] sm:$0xff]  ;;  %v314_v10 = vld [vmem:[#allocation10 + $0x20] sm:$0xff]  ;;  %v466_v24 = vmov 0   ;;  %v243_v35 = vand.u32 127, %v242_v33  ;;  %vm246_vm3 = vcmask 57344  }
  0x19   :  { %99 = vrot.lane.b32.xlu0 %v97_v2, %s465_s2  ;;  %95 = vst.msk [vmem:[#allocation2] sm:$0xf] %vm94_vm0, %v93_v4  ;;  %212 = vmatpush.bf16.msra.mxu1 %v317_v7  ;;  %v313_v11 = vld [vmem:[#allocation10 + $0x18] sm:$0xff]  ;;  %v312_v12 = vld [vmem:[#allocation10 + $0x10] sm:$0xff]  ;;  %v311_v15 = vld [vmem:[#allocation10 + $0x8] sm:$0xff] }
  0x1a   :  { %v310_v16 = vld [vmem:[#allocation10] sm:$0xff]  ;;  %v328_v17 = vld [vmem:[%s543_s3] ss:$0 sm:$0xff]  ;;  %v233_v23 = vld [vmem:[#allocation3] sm:$0x1]  ;;  %327 = vset.pattern.permute.xlu0 %v466_v24  ;;  %s467_s3 = smov [#allocation12]  }
  0x1b   :  { %v329_v25 = vld [vmem:[%s545_s5] ss:$0 sm:$0xff]  ;;  %s253_s9 = sshll.u32 %s467_s3, 4  ;;  %s255_s5 = sshll.u32 %s548_s8, 4  ;;  %s254_s9 = int_to_ptr.vmem [resolvable:$true] %s253_s9  ;;  %s256_s5 = int_to_ptr.hbm [resolvable:$true] %s255_s5 }
  0x1c   :  { %136 = vmatpush.bf16.msra.mxu0 %v308_v6  ;;  %v330_v28 = vld [vmem:[%s546_s6] ss:$0 sm:$0xff] }
  0x1d   :  { %213 = vmatpush.bf16.msra.mxu1 %v316_v8 }
  0x21   :  { %214 = vmatpush.bf16.msra.mxu1 %v315_v9  ;;  %236 = vperm.xlu0 %327, %v233_v23  }
  0x25   :  { %215 = vmatpush.bf16.msra.mxu1 %v314_v10 }
  0x29   :  { %216 = vmatpush.bf16.msra.mxu1 %v313_v11 }
  0x2d   :  { %217 = vmatpush.bf16.msra.mxu1 %v312_v12 }
  0x31   :  { %218 = vmatpush.bf16.msra.mxu1 %v311_v15 }
  0x35   :  { %219 = vmatpush.bf16.msra.mxu1 %v310_v16 }
  0x8b   :  { %v100_v13 = vpop.permute.xlu0 %99 }
  0x8c   :  { %103 = vst.msk [vmem:[#allocation2] sm:$0xf] %vm102_vm1, %v100_v13 }
  0x93   :  { %v104_v14 = vld [vmem:[#allocation2] sm:$0xf]  ;;  %v237_v32 = vpop.permute.xlu0 %236 }
  0x94   :  { %275 = vmatmul.msk.bf16.vlgmr.msra.gmra.mxu0 %vm125_vm2, %v104_v14  ;;  %v239_v34 = vperm.slane %v237_v32, 0 }
 0x111   :  { %v138_v18 = vpop.f32.mrf.mxu0 }
 0x112   :  { %v139_v19 = vadd.f32 %v328_v17, %v138_v18 }
 0x114   :  { %v142_v20 = vmax.f32 %v139_v19, 0.0 }
 0x116   :  { %v143_v21 = vpack.c.bf16 %v142_v20, %v142_v20 }
 0x118   :  { %220 = vmatmul.bf16.vlgmr.msra.gmra.mxu1 %v143_v21 }
 0x119   :  { %v140_v22 = vpop.f32.mrf.mxu0 }
 0x195   :  { %v221_v26 = vpop.f32.mrf.mxu1 }
 0x196   :  { %v222_v27 = vadd.f32 %v329_v25, %v221_v26 }
 0x198   :  { %v225_v29 = vmax.f32 %v222_v27, 0.0 }
 0x19a   :  { %v230_v30 = vmul.f32 %v330_v28, %v225_v29 }
 0x19c   :  { %231 = vadd.xlane.f32.xlu1 %v230_v30 }
 0x19d   :  { %v223_v31 = vpop.f32.mrf.mxu1 }
 0x20f   :  { %v232_v36 = vpop.xlane.xlu1 %231 }
 0x210   :  { %v240_v37 = vadd.f32 %v239_v34, %v232_v36 }
 0x212   :  { %v244_v38 = vperm.slane %v240_v37, %v243_v35 }
 0x214   :  { %247 = vst.msk [vmem:[#allocation12] sm:$0x1] %vm246_vm3, %v244_v38 }
 0x215   :  { %258 = dma.vmem_to_hbm [thread:$0]  %s254_s9, 16, %s256_s5, [#allocation6]  }
 0x216   :  { %457 = dma.done.wait [#allocation6], 16  }
 0x217   :  { %458 = vsyncadd [#allocation6], 4294967280 }
 0x218   :  { %263 = vsyncpa [#allocation5], 1 }
 0x219   :  { %264 = vsyncpa [#allocation8], 1 }
 0x21a   :  { %265 = vsyncpa [#allocation11], 1 }
 0x21b   :  { %266 = vsyncpa [#allocation6], 1 }

</bundles_post_ra>
